<compile_context>
chip_gen: v6e
topology: v6e:2x2x1
jax: 0.10.0
libtpu: 0.0.40
codegen_flags: <defaults>
</compile_context>

<pallas_src>
import functools

import jax
import jax.numpy as jnp
from jax.experimental import pallas as pl
from jax.experimental.pallas import tpu as pltpu


def mlp_kernel(x_ref, w1_ref, b1_ref, w2_ref, b2_ref, o_ref):
    """Fused MLP forward with batch on the lane axis.

    Per-grid-step shapes:
      x_ref:  (in, TB)        w1_ref: (hid_p, in)   b1_ref: (hid_p, 1)
      w2_ref: (hid_p, 1)      b2_ref: (1, 1)        o_ref:  (1, TB)
    """
    in_features = w1_ref.shape[1]
    x = x_ref[...]                                             # (in, TB)

    # Layer 1 on the VPU: unrolled broadcast-FMAs over the tiny (K=3) input
    # feature axis.  An MXU matmul here would use 3/256 of the array and
    # would change numerics (bf16 passes); kept on the VALU for exact f32.
    h = b1_ref[...] + w1_ref[:, 0:1] * x[0:1, :]
    for k in range(1, in_features):
        h = h + w1_ref[:, k:k + 1] * x[k:k + 1, :]
    h = jnp.maximum(h, 0.0)                                    # ReLU, (hid_p, TB)

    # Layer 2 (output_size == 1): VPU multiply + sublane reduction (XLU slot
    # is otherwise idle) instead of an N=1 MXU matmul.
    y = jnp.sum(h * w2_ref[...], axis=0, keepdims=True) + b2_ref[...]
    o_ref[...] = y.astype(o_ref.dtype)                         # (1, TB)


def _round_up(n, m):
    return ((n + m - 1) // m) * m


def _cdiv(a, b):
    return -(-a // b)


def _choose_tiling(batch, max_block_batch):
    """Pick (tb, b_pad): tb is always a multiple of 128; for batches larger
    than one 128-lane tile we keep an even step count >= 2 so the "parallel"
    grid axis can be split across v7x's two TensorCores."""
    tb_cap = max(128, (int(max_block_batch) // 128) * 128)     # 128-aligned cap
    b128 = _round_up(max(batch, 1), 128)
    if b128 <= 128:
        return 128, 128                                        # tiny batch: 1 step
    steps = max(2, _cdiv(b128, tb_cap))
    if steps % 2:
        steps += 1                                             # even count for megacore
    tb = _round_up(_cdiv(b128, steps), 128)
    return tb, tb * steps


def _prep_params(w1, b1, w2, b2):
    """Pad hidden dim to a multiple of 8 (dense sublane groups); reshape for
    the kernel.  Padded rows have zero weight/bias -> contribute exactly 0."""
    hid, _ = w1.shape
    out_size = w2.shape[0]
    assert out_size == 1, "kernel's reduce-based layer 2 assumes output_size=1"
    hid_p = _round_up(hid, 8)
    pad = hid_p - hid
    w1p = jnp.pad(w1, ((0, pad), (0, 0)))                      # (hid_p, in)
    b1p = jnp.pad(b1, ((0, pad),)).reshape(hid_p, 1)           # (hid_p, 1)
    w2p = jnp.pad(w2.T, ((0, pad), (0, 0)))                    # (hid_p, 1)
    b2c = b2.reshape(out_size, 1)                              # (1, 1)
    return w1p, b1p, w2p, b2c


def _mlp_pallas(x_t, w1p, b1p, w2p, b2c, tb):
    """x_t: (in, b_pad) with b_pad % tb == 0, tb % 128 == 0. Returns (1, b_pad)."""
    in_size, b_pad = x_t.shape
    hid_p = w1p.shape[0]
    const = lambda i: (0, 0)                                   # weights stay resident
    return pl.pallas_call(
        mlp_kernel,
        out_shape=jax.ShapeDtypeStruct((1, b_pad), x_t.dtype),
        grid=(b_pad // tb,),
        in_specs=[
            pl.BlockSpec((in_size, tb), lambda i: (0, i)),     # x tile
            pl.BlockSpec((hid_p, in_size), const),             # w1
            pl.BlockSpec((hid_p, 1), const),                   # b1
            pl.BlockSpec((hid_p, 1), const),                   # w2 (transposed)
            pl.BlockSpec((1, 1), const),                       # b2
        ],
        out_specs=pl.BlockSpec((1, tb), lambda i: (0, i)),
        compiler_params=pltpu.CompilerParams(
            dimension_semantics=("parallel",),                 # 2x on v7x megacore
            vmem_limit_bytes=32 * 1024 * 1024,                 # headroom for big tiles
        ),
    )(x_t, w1p, b1p, w2p, b2c)


@functools.partial(jax.jit, static_argnames=("max_block_batch",))
def neural_network_forward(x, w1, b1, w2, b2, *, max_block_batch=16384):
    """Forward pass matching PyTorch's NeuralNetwork (batch-major input).

    Args (PyTorch layouts):
      x : (B, in)        w1: (hidden, in)   b1: (hidden,)
      w2: (out, hidden)  b2: (out,)
    Returns: (B, out)
    """
    batch, _ = x.shape
    out_size = w2.shape[0]
    tb, b_pad = _choose_tiling(batch, max_block_batch)
    # Single fused pad+transpose pass (pad folds into the transpose copy).
    # Callers that can produce x feature-major should use
    # neural_network_forward_feature_major() and skip this HBM pass entirely.
    x_t = jnp.pad(x, ((0, b_pad - batch), (0, 0))).T           # (in, b_pad)
    w1p, b1p, w2p, b2c = _prep_params(w1, b1, w2, b2)
    out_t = _mlp_pallas(x_t, w1p, b1p, w2p, b2c, tb)           # (1, b_pad)
    return out_t[:, :batch].T.reshape(batch, out_size)


@functools.partial(jax.jit, static_argnames=("max_block_batch",))
def neural_network_forward_feature_major(x_t, w1, b1, w2, b2, *,
                                         max_block_batch=16384):
    """Same forward pass, but x is supplied feature-major as (in, B): no
    wrapper transpose HBM pass.  Returns (B, out)."""
    _, batch = x_t.shape
    out_size = w2.shape[0]
    tb, b_pad = _choose_tiling(batch, max_block_batch)
    if b_pad != batch:
        x_t = jnp.pad(x_t, ((0, 0), (0, b_pad - batch)))
    w1p, b1p, w2p, b2c = _prep_params(w1, b1, w2, b2)
    out_t = _mlp_pallas(x_t, w1p, b1p, w2p, b2c, tb)           # (1, b_pad)
    return out_t[:, :batch].T.reshape(batch, out_size)


def init_params(key, input_size=3, hidden_size=39, output_size=1):
    """Deterministic init mirroring torch.nn.Linear's U(-1/sqrt(fan_in), ...)."""
    k1, k2, k3, k4 = jax.random.split(key, 4)
    bound1 = 1.0 / jnp.sqrt(float(input_size))
    bound2 = 1.0 / jnp.sqrt(float(hidden_size))
    # PyTorch layouts: weight is [out, in], bias is [out].
    w1 = jax.random.uniform(k1, (hidden_size, input_size), jnp.float32,
                            -bound1, bound1)
    b1 = jax.random.uniform(k2, (hidden_size,), jnp.float32, -bound1, bound1)
    w2 = jax.random.uniform(k3, (output_size, hidden_size), jnp.float32,
                            -bound2, bound2)
    b2 = jax.random.uniform(k4, (output_size,), jnp.float32, -bound2, bound2)
    return w1, b1, w2, b2


def _reference(x, w1, b1, w2, b2):
    return jnp.maximum(x @ w1.T + b1, 0.0) @ w2.T + b2


if __name__ == "__main__":
    key = jax.random.PRNGKey(0)
    k_x, k_p, k_x2, k_x3 = jax.random.split(key, 4)

    input_size, hidden_size, output_size = 3, 39, 1
    w1, b1, w2, b2 = init_params(k_p, input_size, hidden_size, output_size)

    # 1) Tiny batch (8) -> single 128-lane tile.
    x = jax.random.normal(k_x, (8, input_size), jnp.float32)
    out = jax.block_until_ready(neural_network_forward(x, w1, b1, w2, b2))
    ref = _reference(x, w1, b1, w2, b2)
    assert out.shape == (8, output_size)
    assert jnp.allclose(out, ref, atol=1e-5, rtol=1e-5)

    # 2) Ragged batch (300) with a tiny tile cap -> 4 x 128-lane grid steps.
    x2 = jax.random.normal(k_x2, (300, input_size), jnp.float32)
    out2 = jax.block_until_ready(
        neural_network_forward(x2, w1, b1, w2, b2, max_block_batch=128))
    ref2 = _reference(x2, w1, b1, w2, b2)
    assert out2.shape == (300, output_size)
    assert jnp.allclose(out2, ref2, atol=1e-5, rtol=1e-5)

    # 3) Feature-major fast path (no wrapper transpose pass), even 2-step grid.
    x3 = jax.random.normal(k_x3, (2048, input_size), jnp.float32)
    out3 = jax.block_until_ready(
        neural_network_forward_feature_major(x3.T, w1, b1, w2, b2))
    ref3 = _reference(x3, w1, b1, w2, b2)
    assert out3.shape == (2048, output_size)
    assert jnp.allclose(out3, ref3, atol=1e-5, rtol=1e-5)

    print("KERNEL_OK")
</pallas_src>

<mosaic_0001>
module attributes {stable_mosaic.version = 11 : i64} {
  func.func @mlp_kernel(%arg0: i32, %arg1: memref<3x128xf32, #tpu.memory_space<vmem>>, %arg2: memref<40x3xf32, #tpu.memory_space<vmem>>, %arg3: memref<40x1xf32, #tpu.memory_space<vmem>>, %arg4: memref<40x1xf32, #tpu.memory_space<vmem>>, %arg5: memref<1x1xf32, #tpu.memory_space<vmem>>, %arg6: memref<1x128xf32, #tpu.memory_space<vmem>>) attributes {dimension_semantics = [#tpu.dimension_semantics<parallel>], iteration_bounds = array<i64: 1>, scalar_prefetch = 0 : i64, scratch_operands = 0 : i64, tpu.core_type = #tpu.core_type<tc>, window_params = [{transform_indices = @transform_0, window_bounds = array<i64: 3, 128>}, {pipeline_mode = #tpu.pipeline_mode<synchronous>, transform_indices = @transform_1, window_bounds = array<i64: 40, 3>}, {pipeline_mode = #tpu.pipeline_mode<synchronous>, transform_indices = @transform_2, window_bounds = array<i64: 40, 1>}, {pipeline_mode = #tpu.pipeline_mode<synchronous>, transform_indices = @transform_3, window_bounds = array<i64: 40, 1>}, {pipeline_mode = #tpu.pipeline_mode<synchronous>, transform_indices = @transform_4, window_bounds = array<i64: 1, 1>}, {transform_indices = @transform_5, window_bounds = array<i64: 1, 128>}]} {
    %c0 = arith.constant 0 : index
    %c0_0 = arith.constant 0 : index
    %0 = vector.load %arg1[%c0, %c0_0] : memref<3x128xf32, #tpu.memory_space<vmem>>, vector<3x128xf32>
    %c0_1 = arith.constant 0 : index
    %c0_2 = arith.constant 0 : index
    %1 = vector.load %arg3[%c0_1, %c0_2] : memref<40x1xf32, #tpu.memory_space<vmem>>, vector<40x1xf32>
    %c0_3 = arith.constant 0 : index
    %c0_4 = arith.constant 0 : index
    %2 = vector.load %arg2[%c0_3, %c0_4] : memref<40x3xf32, #tpu.memory_space<vmem>>, vector<40x1xf32>
    %3 = vector.extract_strided_slice %0 {offsets = [0, 0], sizes = [1, 128], strides = [1, 1]} : vector<3x128xf32> to vector<1x128xf32>
    %4 = vector.broadcast %2 : vector<40x1xf32> to vector<40x128xf32>
    %5 = vector.broadcast %3 : vector<1x128xf32> to vector<40x128xf32>
    %6 = arith.mulf %4, %5 : vector<40x128xf32>
    %7 = vector.broadcast %1 : vector<40x1xf32> to vector<40x128xf32>
    %8 = arith.addf %7, %6 : vector<40x128xf32>
    %c0_5 = arith.constant 0 : index
    %c1 = arith.constant 1 : index
    %9 = vector.load %arg2[%c0_5, %c1] : memref<40x3xf32, #tpu.memory_space<vmem>>, vector<40x1xf32>
    %10 = vector.extract_strided_slice %0 {offsets = [1, 0], sizes = [1, 128], strides = [1, 1]} : vector<3x128xf32> to vector<1x128xf32>
    %11 = vector.broadcast %9 : vector<40x1xf32> to vector<40x128xf32>
    %12 = vector.broadcast %10 : vector<1x128xf32> to vector<40x128xf32>
    %13 = arith.mulf %11, %12 : vector<40x128xf32>
    %14 = arith.addf %8, %13 : vector<40x128xf32>
    %c0_6 = arith.constant 0 : index
    %c2 = arith.constant 2 : index
    %15 = vector.load %arg2[%c0_6, %c2] : memref<40x3xf32, #tpu.memory_space<vmem>>, vector<40x1xf32>
    %16 = vector.extract_strided_slice %0 {offsets = [2, 0], sizes = [1, 128], strides = [1, 1]} : vector<3x128xf32> to vector<1x128xf32>
    %17 = vector.broadcast %15 : vector<40x1xf32> to vector<40x128xf32>
    %18 = vector.broadcast %16 : vector<1x128xf32> to vector<40x128xf32>
    %19 = arith.mulf %17, %18 : vector<40x128xf32>
    %20 = arith.addf %14, %19 : vector<40x128xf32>
    %cst = arith.constant 0.000000e+00 : f32
    %21 = vector.broadcast %cst : f32 to vector<40x128xf32>
    %22 = arith.maximumf %20, %21 : vector<40x128xf32>
    %c0_7 = arith.constant 0 : index
    %c0_8 = arith.constant 0 : index
    %23 = vector.load %arg4[%c0_7, %c0_8] : memref<40x1xf32, #tpu.memory_space<vmem>>, vector<40x1xf32>
    %24 = vector.broadcast %23 : vector<40x1xf32> to vector<40x128xf32>
    %25 = arith.mulf %22, %24 : vector<40x128xf32>
    %cst_9 = arith.constant dense<0.000000e+00> : vector<128xf32>
    %26 = vector.multi_reduction <add>, %25, %cst_9 [0] : vector<40x128xf32> to vector<128xf32>
    %27 = vector.shape_cast %26 : vector<128xf32> to vector<1x128xf32>
    %c0_10 = arith.constant 0 : index
    %c0_11 = arith.constant 0 : index
    %28 = vector.load %arg5[%c0_10, %c0_11] : memref<1x1xf32, #tpu.memory_space<vmem>>, vector<1x1xf32>
    %29 = vector.broadcast %28 : vector<1x1xf32> to vector<1x128xf32>
    %30 = arith.addf %27, %29 : vector<1x128xf32>
    %c0_12 = arith.constant 0 : index
    %c0_13 = arith.constant 0 : index
    %31 = vector.load %arg6[%c0_12, %c0_13] : memref<1x128xf32, #tpu.memory_space<vmem>>, vector<1x128xf32>
    tpu.vector_store %arg6[%c0_12, %c0_13], %30 {strides = array<i32>} : memref<1x128xf32, #tpu.memory_space<vmem>>, vector<1x128xf32>,
    return
  }
  func.func @transform_0(%arg0: i32) -> (i32, i32) {
    %c0_i32 = arith.constant 0 : i32
    %c0_i32_0 = arith.constant 0 : i32
    return %c0_i32, %arg0 : i32, i32
  }
  func.func @transform_1(%arg0: i32) -> (i32, i32) {
    %c0_i32 = arith.constant 0 : i32
    %c0_i32_0 = arith.constant 0 : i32
    %c0_i32_1 = arith.constant 0 : i32
    return %c0_i32, %c0_i32_0 : i32, i32
  }
  func.func @transform_2(%arg0: i32) -> (i32, i32) {
    %c0_i32 = arith.constant 0 : i32
    %c0_i32_0 = arith.constant 0 : i32
    %c0_i32_1 = arith.constant 0 : i32
    return %c0_i32, %c0_i32_0 : i32, i32
  }
  func.func @transform_3(%arg0: i32) -> (i32, i32) {
    %c0_i32 = arith.constant 0 : i32
    %c0_i32_0 = arith.constant 0 : i32
    %c0_i32_1 = arith.constant 0 : i32
    return %c0_i32, %c0_i32_0 : i32, i32
  }
  func.func @transform_4(%arg0: i32) -> (i32, i32) {
    %c0_i32 = arith.constant 0 : i32
    %c0_i32_0 = arith.constant 0 : i32
    %c0_i32_1 = arith.constant 0 : i32
    return %c0_i32, %c0_i32_0 : i32, i32
  }
  func.func @transform_5(%arg0: i32) -> (i32, i32) {
    %c0_i32 = arith.constant 0 : i32
    %c0_i32_0 = arith.constant 0 : i32
    return %c0_i32, %arg0 : i32, i32
  }
}

</mosaic_0001>

<bundles_post_ra>
// kernel: neural_network_forward.1
= control target key start
LH: loop header
LB: loop body
LE: loop exit
PB: predicated region body
PF: predicated region fallthrough
CT: control target
= control target key end

     0   :  { %v247_v0 = vmov 0   ;;  %v248_v7 = vmov 1   ;;  %v249_v10 = vmov 2   ;;  %v58_v30 = vlaneseq  ;;  %s343_s1 = inlined_call_operand.vmem [shape: f32[40,3], index: 1, kind: input, shape index: {}]   ;;  %s344_s2 = inlined_call_operand.vmem [shape: f32[40,1], index: 2, kind: input, shape index: {}]   ;;  %s345_s4 = inlined_call_operand.<no memory space> [shape: f32[1,1], index: 4, kind: input, shape index: {}]   ;;  %s346_s3 = inlined_call_operand.vmem [shape: f32[40,1], index: 3, kind: input, shape index: {}]   ;;  %s347_s0 = inlined_call_operand.vmem [shape: f32[3,128], index: 0, kind: input, shape index: {}]   ;;  %s348_s5 = inlined_call_operand.vmem [shape: f32[1,128], index: 5, kind: output, shape index: {}]  }
   0x1   :  { %235 = vset.pattern.permute.xlu1 %v247_v0  ;;  %234 = vset.pattern.permute.xlu0 %v247_v0  ;;  %v30_v1 = vld [vmem:[%s343_s1 + $0x10] sm:$0xff]  ;;  %v28_v2 = vld [vmem:[%s343_s1] sm:$0xff]  ;;  %v10_v3 = vstv %s345_s4  ;;  %v29_v5 = vld [vmem:[%s343_s1 + $0x8] sm:$0xff] }
   0x2   :  { %45 = vperm.xlu1 %235, %v30_v1   ;;  %35 = vperm.xlu0 %234, %v28_v2   ;;  %11 = vst [vmem:[#allocation2] sm:$0x1] %v10_v3  ;;  %v23_v4 = vld [vmem:[%s344_s2] sm:$0xff]  ;;  %v24_v6 = vld [vmem:[%s344_s2 + $0x8] sm:$0xff]  ;;  %v31_v8 = vld [vmem:[%s343_s1 + $0x18] sm:$0xff]  ;;  %v328_v33 = vshrl.u32 %v58_v30, 7 }
   0x3   :  { %v25_v9 = vld [vmem:[%s344_s2 + $0x10] sm:$0xff]  ;;  %v32_v11 = vld [vmem:[%s343_s1 + $0x20] sm:$0xff]  ;;  %v26_v12 = vld [vmem:[%s344_s2 + $0x18] sm:$0xff] }
   0x4   :  { %v172_v13 = vld [vmem:[%s346_s3 + $0x10] sm:$0xff]  ;;  %v27_v14 = vld [vmem:[%s344_s2 + $0x20] sm:$0xff]  ;;  %v171_v17 = vld [vmem:[%s346_s3 + $0x8] sm:$0xff]  ;;  %v60_v36 = vsub.s32 0, %v328_v33  ;;  %v119_v38 = vsub.s32 1, %v328_v33  ;;  %v153_v41 = vsub.s32 2, %v328_v33 }
   0x5   :  { %v170_v16 = vld [vmem:[%s346_s3] sm:$0xff]  ;;  %v173_v18 = vld [vmem:[%s346_s3 + $0x18] sm:$0xff] }
   0x6   :  { %69 = vperm.xlu1 %235, %v23_v4   ;;  %40 = vperm.xlu0 %234, %v29_v5   ;;  %v174_v19 = vld [vmem:[%s346_s3 + $0x20] sm:$0xff] }
   0x7   :  { %v22_v37 = vld [vmem:[%s347_s0] sm:$0x7] }
   0x8   :  { %v61_v40 = vrot.slane %v22_v37, %v60_v36  ;;  %v120_v44 = vrot.slane %v22_v37, %v119_v38  ;;  %v154_v46 = vrot.slane %v22_v37, %v153_v41 }
   0x9   :  { %v215_v15 = vld [vmem:[#allocation2] sm:$0x1] }
   0xa   :  { %236 = vset.pattern.permute.xlu1 %v248_v7  ;;  %74 = vperm.xlu0 %234, %v24_v6  }
   0xb   :  { %98 = vperm.xlu1 %236, %v28_v2  }
   0xe   :  { %237 = vset.pattern.permute.xlu0 %v248_v7 }
   0xf   :  { %238 = vset.pattern.permute.xlu1 %v247_v0  ;;  %102 = vperm.xlu0 %237, %v29_v5  }
  0x10   :  { %50 = vperm.xlu1 %238, %v31_v8  }
  0x13   :  { %106 = vperm.xlu0 %237, %v30_v1  }
  0x14   :  { %79 = vperm.xlu1 %238, %v25_v9  }
  0x17   :  { %110 = vperm.xlu0 %237, %v31_v8  }
  0x18   :  { %239 = vset.pattern.permute.xlu1 %v249_v10 }
  0x19   :  { %132 = vperm.xlu1 %239, %v28_v2  }
  0x1b   :  { %114 = vperm.xlu0 %237, %v32_v11  }
  0x1d   :  { %240 = vset.pattern.permute.xlu1 %v247_v0 }
  0x1e   :  { %55 = vperm.xlu1 %240, %v32_v11  }
  0x1f   :  { %243 = vset.pattern.permute.xlu0 %v249_v10 }
  0x20   :  { %136 = vperm.xlu0 %243, %v29_v5  }
  0x22   :  { %84 = vperm.xlu1 %240, %v26_v12  }
  0x24   :  { %148 = vperm.xlu0 %243, %v32_v11  }
  0x26   :  { %241 = vset.pattern.permute.xlu1 %v249_v10 }
  0x27   :  { %140 = vperm.xlu1 %241, %v30_v1  }
  0x28   :  { %246 = vset.pattern.permute.xlu0 %v247_v0 }
  0x29   :  { %187 = vperm.xlu0 %246, %v172_v13  }
  0x2b   :  { %242 = vset.pattern.permute.xlu1 %v247_v0 }
  0x2c   :  { %89 = vperm.xlu1 %242, %v27_v14  }
  0x2d   :  { %218 = vperm.xlu0 %246, %v215_v15  }
  0x30   :  { %244 = vset.pattern.permute.xlu1 %v249_v10 }
  0x31   :  { %144 = vperm.xlu1 %244, %v31_v8  }
  0x35   :  { %245 = vset.pattern.permute.xlu1 %v247_v0 }
  0x36   :  { %177 = vperm.xlu1 %245, %v170_v16  }
  0x3a   :  { %182 = vperm.xlu1 %245, %v171_v17  }
  0x3e   :  { %192 = vperm.xlu1 %245, %v173_v18  }
  0x42   :  { %197 = vperm.xlu1 %245, %v174_v19  }
  0x7d   :  { %v46_v20 = vpop.permute.xlu1 %45  ;;  %v36_v21 = vpop.permute.xlu0 %35 }
  0x7e   :  { %v62_v45 = vmul.f32 %v61_v40, %v36_v21  ;;  %v64_v48 = vmul.f32 %v61_v40, %v46_v20 }
  0x81   :  { %v70_v22 = vpop.permute.xlu1 %69  ;;  %v41_v23 = vpop.permute.xlu0 %40 }
  0x82   :  { %v63_v43 = vmul.f32 %v61_v40, %v41_v23  ;;  %v92_v55 = vadd.f32 %v70_v22, %v62_v45 }
  0x85   :  { %v75_v25 = vpop.permute.xlu0 %74 }
  0x86   :  { %v99_v24 = vpop.permute.xlu1 %98  ;;  %v93_v50 = vadd.f32 %v75_v25, %v63_v43 }
  0x87   :  { %v121_v49 = vmul.f32 %v120_v44, %v99_v24 }
  0x89   :  { %v126_v61 = vadd.f32 %v121_v49, %v92_v55 }
  0x8a   :  { %v103_v28 = vpop.permute.xlu0 %102 }
  0x8b   :  { %v51_v26 = vpop.permute.xlu1 %50  ;;  %v122_v51 = vmul.f32 %v120_v44, %v103_v28 }
  0x8c   :  { %v65_v57 = vmul.f32 %v61_v40, %v51_v26 }
  0x8d   :  { %v127_v62 = vadd.f32 %v122_v51, %v93_v50 }
  0x8e   :  { %v107_v31 = vpop.permute.xlu0 %106 }
  0x8f   :  { %v80_v27 = vpop.permute.xlu1 %79  ;;  %v123_v54 = vmul.f32 %v120_v44, %v107_v31 }
  0x90   :  { %v94_v53 = vadd.f32 %v80_v27, %v64_v48 }
  0x92   :  { %v111_v34 = vpop.permute.xlu0 %110  ;;  %v128_v63 = vadd.f32 %v123_v54, %v94_v53 }
  0x93   :  { %v124_v0 = vmul.f32 %v120_v44, %v111_v34 }
  0x94   :  { %v133_v29 = vpop.permute.xlu1 %132 }
  0x95   :  { %v155_v56 = vmul.f32 %v154_v46, %v133_v29 }
  0x96   :  { %v115_v42 = vpop.permute.xlu0 %114 }
  0x97   :  { %v160_v3 = vadd.f32 %v155_v56, %v126_v61  ;;  %v125_v10 = vmul.f32 %v120_v44, %v115_v42 }
  0x99   :  { %v56_v32 = vpop.permute.xlu1 %55  ;;  %v165_v13 = vmax.f32 %v160_v3, 0.0 }
  0x9a   :  { %v66_v1 = vmul.f32 %v61_v40, %v56_v32 }
  0x9b   :  { %v137_v52 = vpop.permute.xlu0 %136 }
  0x9c   :  { %v156_v58 = vmul.f32 %v154_v46, %v137_v52 }
  0x9d   :  { %v85_v35 = vpop.permute.xlu1 %84 }
  0x9e   :  { %v95_v2 = vadd.f32 %v85_v35, %v65_v57  ;;  %v161_v5 = vadd.f32 %v156_v58, %v127_v62 }
  0x9f   :  { %v149_v4 = vpop.permute.xlu0 %148 }
  0xa0   :  { %v129_v11 = vadd.f32 %v124_v0, %v95_v2  ;;  %v159_v12 = vmul.f32 %v154_v46, %v149_v4  ;;  %v166_v17 = vmax.f32 %v161_v5, 0.0 }
  0xa2   :  { %v141_v39 = vpop.permute.xlu1 %140 }
  0xa3   :  { %v157_v59 = vmul.f32 %v154_v46, %v141_v39 }
  0xa4   :  { %v188_v18 = vpop.permute.xlu0 %187 }
  0xa5   :  { %v162_v6 = vadd.f32 %v157_v59, %v128_v63 }
  0xa7   :  { %v90_v47 = vpop.permute.xlu1 %89  ;;  %v167_v15 = vmax.f32 %v162_v6, 0.0 }
  0xa8   :  { %v96_v7 = vadd.f32 %v90_v47, %v66_v1  ;;  %v219_v40 = vpop.permute.xlu0 %218 }
  0xa9   :  { %v202_v22 = vmul.f32 %v188_v18, %v167_v15  ;;  %v224_v42 = vrot.slane %v219_v40, %v60_v36 }
  0xaa   :  { %v130_v14 = vadd.f32 %v125_v10, %v96_v7 }
  0xac   :  { %v145_v60 = vpop.permute.xlu1 %144  ;;  %v164_v25 = vadd.f32 %v159_v12, %v130_v14 }
  0xad   :  { %v158_v8 = vmul.f32 %v154_v46, %v145_v60 }
  0xae   :  { %v169_v29 = vmax.f32 %v164_v25, 0.0 }
  0xaf   :  { %v163_v16 = vadd.f32 %v158_v8, %v129_v11 }
  0xb1   :  { %v178_v9 = vpop.permute.xlu1 %177  ;;  %v168_v24 = vmax.f32 %v163_v16, 0.0 }
  0xb2   :  { %v200_v20 = vmul.f32 %v178_v9, %v165_v13 }
  0xb5   :  { %v183_v19 = vpop.permute.xlu1 %182 }
  0xb6   :  { %v201_v21 = vmul.f32 %v183_v19, %v166_v17 }
  0xb8   :  { %v205_v23 = vadd.f32 %v201_v21, %v200_v20 }
  0xb9   :  { %v193_v26 = vpop.permute.xlu1 %192 }
  0xba   :  { %v203_v27 = vmul.f32 %v193_v26, %v168_v24  ;;  %v206_v28 = vadd.f32 %v205_v23, %v202_v22 }
  0xbc   :  { %v207_v31 = vadd.f32 %v206_v28, %v203_v27 }
  0xbd   :  { %v198_v30 = vpop.permute.xlu1 %197 }
  0xbe   :  { %v204_v32 = vmul.f32 %v198_v30, %v169_v29 }
  0xc0   :  { %v208_v34 = vadd.f32 %v207_v31, %v204_v32 }
  0xc2   :  { %v209_v35 = vrot.slane %v208_v34, 4 }
  0xc4   :  { %v210_v37 = vadd.f32 %v209_v35, %v208_v34 }
  0xc6   :  { %v211_v38 = vrot.slane %v210_v37, 2 }
  0xc8   :  { %v212_v39 = vadd.f32 %v211_v38, %v210_v37 }
  0xca   :  { %v213_v41 = vrot.slane %v212_v39, 1 }
  0xcc   :  { %v214_v43 = vadd.f32 %v213_v41, %v212_v39 }
  0xce   :  { %v225_v44 = vadd.f32 %v224_v42, %v214_v43 }
  0xd0   :  { %226 = vst [vmem:[%s348_s5] sm:$0x1] %v225_v44 }

</bundles_post_ra>
